<compile_context>
chip_gen: v6e
topology: v6e:2x2x1
jax: 0.10.0
libtpu: 0.0.40
codegen_flags: <defaults>
</compile_context>

<pallas_src>
import jax
import jax.numpy as jnp
from jax.experimental import pallas as pl
from jax.experimental.pallas import tpu as pltpu


def _round_up(x, m):
    return (x + m - 1) // m * m


def _start_logits_kernel(x_ref, w_ref, b_ref, o_ref, acc_ref):
    # x_ref: (tm, tk)   w_ref: (tk, C)   b_ref: (1, C) f32
    # o_ref: (tm, C)    acc_ref: (tm, C) f32 scratch
    k = pl.program_id(1)

    @pl.when(k == 0)
    def _():
        acc_ref[...] = jnp.zeros_like(acc_ref)

    acc_ref[...] += jnp.dot(x_ref[...], w_ref[...],
                            preferred_element_type=jnp.float32)

    @pl.when(k == pl.num_programs(1) - 1)
    def _():
        o_ref[...] = (acc_ref[...] + b_ref[...]).astype(o_ref.dtype)


def prepare_pooler_start_logits_params(weight, bias):
    """One-time parameter prep (hoisted out of the per-call path).

    weight: [C, H] (PyTorch nn.Linear layout), bias: [C].
    Returns (w_hc [H, C], b_row [1, C] float32).
    """
    w_hc = jnp.asarray(weight).T                                  # [H, C]
    b_row = jnp.asarray(bias, dtype=jnp.float32).reshape(1, -1)   # [1, C] f32
    return w_hc, b_row


# VMEM budget for the pipeline working set (double-buffered activation/weight/
# output blocks + accumulator).  Kept below v7x's 64 MiB physical VMEM with
# headroom; on v5e/v6e (128 MiB) the explicit vmem_limit_bytes unlocks it past
# the default scoped limit.
_VMEM_BUDGET_BYTES = 28 * 1024 * 1024
_MIN_TM_BEFORE_K_SPLIT = 256


def _vmem_footprint_bytes(tm, tk, C, x_item, w_item, out_item):
    """Approximate VMEM use, with lane/sublane tile padding accounted for."""
    c_ln = _round_up(C, 128)
    tk_ln = _round_up(tk, 128)
    x_blk = 2 * tm * tk_ln * x_item                 # double-buffered activations
    w_blk = 2 * _round_up(tk, 8) * c_ln * w_item    # weight block
    b_blk = 2 * 8 * c_ln * 4                        # f32 bias row
    o_blk = 2 * tm * c_ln * out_item                # output block
    acc = tm * c_ln * 4                             # accumulator scratch
    return x_blk + w_blk + b_blk + o_blk + acc


def _choose_tiles(M, H, C, x_item, w_item, out_item):
    """Pick (tm, tk) from the VMEM budget.

    tk == H unless H is so large that a reasonable tm no longer fits, in which
    case the contraction axis is split into lane-aligned chunks dividing H.
    """
    c_ln = _round_up(C, 128)

    def tm_for(tk):
        fixed = 2 * _round_up(tk, 8) * c_ln * w_item + 2 * 8 * c_ln * 4
        per_row = 2 * _round_up(tk, 128) * x_item + 2 * c_ln * out_item + c_ln * 4
        avail = _VMEM_BUDGET_BYTES - fixed
        return max(avail // per_row, 8)

    tk = H
    while (tm_for(tk) < _MIN_TM_BEFORE_K_SPLIT
           and H % 128 == 0 and tk > 128
           and (tk // 2) % 128 == 0 and H % (tk // 2) == 0):
        tk //= 2

    M8 = _round_up(M, 8)
    tm = int(min((tm_for(tk) // 8) * 8, M8))
    tm = max(tm, 8)

    # Prefer a tile that divides the row count exactly (no row padding, so the
    # result is a pure reshape with no post-call slice pass over HBM).
    if M == M8 and M8 % tm != 0:
        for cand in range(tm, max(8, tm // 4) - 1, -8):
            if M8 % cand == 0:
                tm = cand
                break

    # v7x has 2 TensorCores: ensure the "parallel" M axis has >= 2 steps so
    # both cores get work (one extra cheap grid step on single-TC v5e/v6e).
    if M8 // tm < 2 and M8 >= 16:
        if (M8 // 2) % 8 == 0:
            tm = M8 // 2
        else:
            tm = _round_up((M8 + 1) // 2, 8)

    return tm, tk


def pooler_start_logits(hidden_states, p_mask, w_hc, b_row):
    """hidden_states: [B, S, H]; p_mask: [B, S] (unused by the reference
    forward, kept for API parity); w_hc: [H, C]; b_row: [1, C] float32.
    Returns logits [B, S, C] in hidden_states.dtype."""
    del p_mask  # the reference PyTorch forward ignores p_mask

    B, S, H = hidden_states.shape
    C = w_hc.shape[1]
    M = B * S

    x_item = jnp.dtype(hidden_states.dtype).itemsize
    w_item = jnp.dtype(w_hc.dtype).itemsize
    out_item = x_item

    tm, tk = _choose_tiles(M, H, C, x_item, w_item, out_item)
    M_pad = _round_up(M, tm)
    num_m = M_pad // tm
    num_k = H // tk

    x2d = hidden_states.reshape(M, H)
    if M_pad != M:
        x2d = jnp.pad(x2d, ((0, M_pad - M), (0, 0)))

    cost = pl.CostEstimate(
        flops=2 * M_pad * H * C,
        transcendentals=0,
        bytes_accessed=(M_pad * H * x_item
                        + (num_m if num_k > 1 else 1) * H * C * w_item
                        + C * 4
                        + M_pad * C * out_item),
    )

    vmem_limit = int(
        _vmem_footprint_bytes(tm, tk, C, x_item, w_item, out_item) * 1.4
    ) + (4 << 20)

    out = pl.pallas_call(
        _start_logits_kernel,
        out_shape=jax.ShapeDtypeStruct((M_pad, C), hidden_states.dtype),
        grid_spec=pltpu.PrefetchScalarGridSpec(
            num_scalar_prefetch=0,
            grid=(num_m, num_k),
            in_specs=[
                pl.BlockSpec((tm, tk), lambda i, k: (i, k)),   # activations: streamed
                pl.BlockSpec((tk, C), lambda i, k: (k, 0)),    # weight: resident per k
                pl.BlockSpec((1, C), lambda i, k: (0, 0)),     # f32 bias row: resident
            ],
            out_specs=pl.BlockSpec((tm, C), lambda i, k: (i, 0)),
            scratch_shapes=[pltpu.VMEM((tm, C), jnp.float32)],
        ),
        compiler_params=pltpu.CompilerParams(
            dimension_semantics=("parallel", "arbitrary"),
            vmem_limit_bytes=vmem_limit,
        ),
        cost_estimate=cost,
    )(x2d, w_hc, b_row)

    if M_pad != M:
        out = out[:M]
    return out.reshape(B, S, C)


if __name__ == "__main__":
    # Small shapes consistent with the module: batch=2, seq=8, hidden=32, num_classes=4
    B, S, H, C = 2, 8, 32, 4

    key = jax.random.PRNGKey(0)
    k_x, k_w, k_b = jax.random.split(key, 3)

    hidden_states = jax.random.normal(k_x, (B, S, H), dtype=jnp.float32)
    p_mask = jnp.zeros((B, S), dtype=jnp.float32)  # unused by forward, API parity only

    # nn.Linear(hidden_size, num_classes) params: weight [C, H], bias [C]
    weight = jax.random.normal(k_w, (C, H), dtype=jnp.float32) * 0.02
    bias = jax.random.normal(k_b, (C,), dtype=jnp.float32) * 0.02

    # One-time param prep (transpose + f32 bias row), hoisted out of the forward.
    w_hc, b_row = prepare_pooler_start_logits_params(weight, bias)

    out = pooler_start_logits(hidden_states, p_mask, w_hc, b_row)
    out = jax.block_until_ready(out)

    # Reference check in plain JAX
    ref = hidden_states @ weight.T + bias
    assert out.shape == (B, S, C)
    assert jnp.allclose(out, ref, atol=1e-5, rtol=1e-5)

    print("KERNEL_OK")
</pallas_src>

<mosaic_0001>
module attributes {stable_mosaic.version = 11 : i64} {
  func.func @_start_logits_kernel(%arg0: i32, %arg1: i32, %arg2: memref<8x32xf32, #tpu.memory_space<vmem>>, %arg3: memref<32x4xf32, #tpu.memory_space<vmem>>, %arg4: memref<1x4xf32, #tpu.memory_space<vmem>>, %arg5: memref<8x4xf32, #tpu.memory_space<vmem>>, %arg6: memref<8x4xf32, #tpu.memory_space<vmem>>) attributes {dimension_semantics = [#tpu.dimension_semantics<parallel>, #tpu.dimension_semantics<arbitrary>], iteration_bounds = array<i64: 2, 1>, scalar_prefetch = 0 : i64, scratch_operands = 1 : i64, tpu.core_type = #tpu.core_type<tc>, window_params = [{transform_indices = @transform_0, window_bounds = array<i64: 8, 32>}, {transform_indices = @transform_1, window_bounds = array<i64: 32, 4>}, {pipeline_mode = #tpu.pipeline_mode<synchronous>, transform_indices = @transform_2, window_bounds = array<i64: 1, 4>}, {transform_indices = @transform_3, window_bounds = array<i64: 8, 4>}]} {
    %c0_i32 = arith.constant 0 : i32
    %0 = arith.cmpi eq, %arg1, %c0_i32 : i32
    %1 = arith.extui %0 : i1 to i32
    %c0_i32_0 = arith.constant 0 : i32
    %2 = arith.cmpi ne, %1, %c0_i32_0 : i32
    scf.if %2 {
      %cst_10 = arith.constant 0.000000e+00 : f32
      %12 = vector.broadcast %cst_10 : f32 to vector<8x4xf32>
      %c0_11 = arith.constant 0 : index
      %c0_12 = arith.constant 0 : index
      %13 = vector.load %arg6[%c0_11, %c0_12] : memref<8x4xf32, #tpu.memory_space<vmem>>, vector<8x4xf32>
      tpu.vector_store %arg6[%c0_11, %c0_12], %12 {strides = array<i32>} : memref<8x4xf32, #tpu.memory_space<vmem>>, vector<8x4xf32>,
    } else {
    }
    %c0 = arith.constant 0 : index
    %c0_1 = arith.constant 0 : index
    %3 = vector.load %arg6[%c0, %c0_1] : memref<8x4xf32, #tpu.memory_space<vmem>>, vector<8x4xf32>
    %c0_2 = arith.constant 0 : index
    %c0_3 = arith.constant 0 : index
    %4 = vector.load %arg2[%c0_2, %c0_3] : memref<8x32xf32, #tpu.memory_space<vmem>>, vector<8x32xf32>
    %c0_4 = arith.constant 0 : index
    %c0_5 = arith.constant 0 : index
    %5 = vector.load %arg3[%c0_4, %c0_5] : memref<32x4xf32, #tpu.memory_space<vmem>>, vector<32x4xf32>
    %cst = arith.constant dense<0.000000e+00> : vector<8x4xf32>
    %6 = tpu.matmul %4, %5, %cst {dimension_numbers = #tpu.dot_dimension_numbers<[1], [0], [0], [1], [0, 0, 1, 1], [], []>} : vector<8x32xf32>, vector<32x4xf32>, vector<8x4xf32> -> vector<8x4xf32>
    %7 = arith.addf %3, %6 : vector<8x4xf32>
    %c0_6 = arith.constant 0 : index
    %c0_7 = arith.constant 0 : index
    %8 = vector.load %arg6[%c0_6, %c0_7] : memref<8x4xf32, #tpu.memory_space<vmem>>, vector<8x4xf32>
    tpu.vector_store %arg6[%c0_6, %c0_7], %7 {strides = array<i32>} : memref<8x4xf32, #tpu.memory_space<vmem>>, vector<8x4xf32>,
    %c0_i32_8 = arith.constant 0 : i32
    %9 = arith.cmpi eq, %arg1, %c0_i32_8 : i32
    %10 = arith.extui %9 : i1 to i32
    %c0_i32_9 = arith.constant 0 : i32
    %11 = arith.cmpi ne, %10, %c0_i32_9 : i32
    scf.if %11 {
      %c0_10 = arith.constant 0 : index
      %c0_11 = arith.constant 0 : index
      %12 = vector.load %arg6[%c0_10, %c0_11] : memref<8x4xf32, #tpu.memory_space<vmem>>, vector<8x4xf32>
      %c0_12 = arith.constant 0 : index
      %c0_13 = arith.constant 0 : index
      %13 = vector.load %arg4[%c0_12, %c0_13] : memref<1x4xf32, #tpu.memory_space<vmem>>, vector<1x4xf32>
      %14 = vector.broadcast %13 : vector<1x4xf32> to vector<8x4xf32>
      %15 = arith.addf %12, %14 : vector<8x4xf32>
      %c0_14 = arith.constant 0 : index
      %c0_15 = arith.constant 0 : index
      %16 = vector.load %arg5[%c0_14, %c0_15] : memref<8x4xf32, #tpu.memory_space<vmem>>, vector<8x4xf32>
      tpu.vector_store %arg5[%c0_14, %c0_15], %15 {strides = array<i32>} : memref<8x4xf32, #tpu.memory_space<vmem>>, vector<8x4xf32>,
    } else {
    }
    return
  }
  func.func @transform_0(%arg0: i32, %arg1: i32) -> (i32, i32) {
    %c0_i32 = arith.constant 0 : i32
    return %arg0, %arg1 : i32, i32
  }
  func.func @transform_1(%arg0: i32, %arg1: i32) -> (i32, i32) {
    %c0_i32 = arith.constant 0 : i32
    %c0_i32_0 = arith.constant 0 : i32
    return %arg1, %c0_i32 : i32, i32
  }
  func.func @transform_2(%arg0: i32, %arg1: i32) -> (i32, i32) {
    %c0_i32 = arith.constant 0 : i32
    %c0_i32_0 = arith.constant 0 : i32
    %c0_i32_1 = arith.constant 0 : i32
    return %c0_i32, %c0_i32_0 : i32, i32
  }
  func.func @transform_3(%arg0: i32, %arg1: i32) -> (i32, i32) {
    %c0_i32 = arith.constant 0 : i32
    %c0_i32_0 = arith.constant 0 : i32
    return %arg0, %c0_i32 : i32, i32
  }
}

</mosaic_0001>

<bundles_post_ra>
// kernel: tpu_custom_call.1
= control target key start
LH: loop header
LB: loop body
LE: loop exit
PB: predicated region body
PF: predicated region fallthrough
CT: control target
= control target key end

     0   :  { %s493_s12 = smov 0   ;;  %s495_s13 = smov 0   ;;  %s544_s0 = inlined_call_operand.vmem [shape: f32[16,32], index: 0, kind: input, shape index: {}]   ;;  %s545_s1 = inlined_call_operand.vmem [shape: f32[32,4], index: 1, kind: input, shape index: {}]   ;;  %s546_s2 = inlined_call_operand.vmem [shape: f32[1,4], index: 2, kind: input, shape index: {}]   ;;  %s547_s3 = inlined_call_operand.vmem [shape: f32[16,4], index: 3, kind: output, shape index: {}]  }
   0x1   :  { %s497_s14 = smov 0  }
   0x2 LB: > { %s25_s15 = sadd.s32 1, %s465_s13  ;;  %p398_p0 = scmp.ge.s32.totalorder %s469_s14, 1  ;;  %s469_s14 = sphi %s497_s14, %s13_s14   ;;  %s465_s13 = sphi %s495_s13, %s549_s13   ;;  %s461_s12 = sphi %s493_s12, %s548_s12  }
   0x3   : > { %p27_p1 = scmp.ge.s32.totalorder %s25_s15, 2  ;;  %p164_p2 = scmp.lt.s32.totalorder %s469_s14, 3 }
   0x5   : > { %s551_s15 = smov (%p27_p1, %s25_s15), 0  ;;  %p165_p3 = pnand %p398_p0, %p164_p2 }
   0x6   : > { %p194_p4 = scmp.lt.s32.totalorder (!%p165_p3), %s461_s12, 1 }
   0x7   : > { %168 = sbr.rel (%p165_p3) target bundleno = 227 (0xe3), region = 32 }
   0xc   : > { %v222_v0 = vld [vmem:[%s545_s1 + $0x18] sm:$0xff]  ;;  %v471_v1 = vmov 0.0   ;;  %v221_v2 = vld [vmem:[%s545_s1 + $0x10] sm:$0xff]  ;;  %vm472_vm0 = vmmov 0   ;;  %vm215_vm1 = vcmask 31744   ;;  %s553_s12 = smov (!%p194_p4, %s461_s12), 1 }
   0xd   : > { %410 = vmatprep.subr.mxu0 %v471_v1  ;;  %418 = vmatprep.mubr.msk.f32.mxu0 %vm472_vm0, %v471_v1  ;;  %216 = vst.msk [vmem:[#allocation2] sm:$0xff] %vm215_vm1, %v471_v1  ;;  %v220_v3 = vld [vmem:[%s545_s1 + $0x8] sm:$0xff]  ;;  %s399_s22 = sshll.u32 %s553_s12, 3  ;;  %v219_v4 = vld [vmem:[%s545_s1] sm:$0xff]  ;;  %vm223_vm2 = vcmask 261120  }
   0xe   : > { %411 = vmatpush3.msra.mxu0 %v222_v0  ;;  %s200_s27 = scalar_lea.vmem %s544_s0, %s399_s22  ;;  %v402_v10 = vld [vmem:[%s546_s2] ss:$0 sm:$0xff]  ;;  %s210_s5 = scalar_lea.vmem %s547_s3, %s399_s22 }
   0xf   : > { %412 = vmatprep.subr.mxu0 %v471_v1  ;;  %v218_v5 = vld [vmem:[%s200_s27] sm:$0xff] }
  0x10   : > { %413 = vmatpush3.msra.mxu0 %v221_v2 }
  0x11   : > { %414 = vmatprep.subr.mxu0 %v471_v1 }
  0x12   : > { %415 = vmatpush3.msra.mxu0 %v220_v3 }
  0x13   : > { %416 = vmatprep.subr.mxu0 %v471_v1 }
  0x14   : > { %417 = vmatpush3.msra.mxu0 %v219_v4  ;;  %v217_v6 = vld [vmem:[#allocation2] sm:$0xff] }
  0x15   : > { %419 = vmatmul.mubr.msk.f32.vlgmr.msra.gmra.mxu0 %vm223_vm2, %v218_v5 }
  0xd5   : > { %v293_v7 = vpop.f32.mrf.mxu0 }
  0xd6   : > { %v297_v8 = vadd.f32 %v293_v7, %v217_v6 }
  0xd7   : > { %v420_v9 = vpop.f32.mrf.mxu0 }
  0xd8   : > { %299 = vst.msk [vmem:[#allocation2] sm:$0xff] %vm215_vm1, %v297_v8 }
  0xdf   : > { %v303_v11 = vld [vmem:[#allocation2] sm:$0xff] }
  0xe0   : > { %v311_v12 = vadd.f32 %v402_v10, %v303_v11 }
  0xe2   : > { %312 = vst.msk [vmem:[%s210_s5] sm:$0xff] %vm215_vm1, %v311_v12 }
  0xe3 PF: > { %s13_s14 = sadd.s32 1, %s469_s14   ;;  %s548_s12 = smov %s465_s13 }
  0xe4   : > { %p10_p5 = scmp.ge.s32.totalorder %s13_s14, 4   ;;  %s549_s13 = smov %s551_s15 }
  0xe6   :  { %12 = sbr.rel (!%p10_p5) target bundleno = 2 (0x2), region = 73 }

</bundles_post_ra>
